<compile_context>
chip_gen: v5e
topology: v5e:2x2
jax: 0.10.0
libtpu: 0.0.40
codegen_flags: <defaults>
</compile_context>

<pallas_src>
import functools

import jax
import jax.numpy as jnp
from jax.experimental import pallas as pl
from jax.experimental.pallas import tpu as pltpu


def _round_up(x, m):
    return ((x + m - 1) // m) * m


def _physical_vmem_bytes():
    """Per-core VMEM capacity; conservative 64 MiB (v7x) fallback if unknown."""
    try:
        info = pltpu.get_tpu_info()
        v = getattr(info, "vmem_capacity_bytes", None)
        if v:
            return int(v)
    except Exception:
        pass
    return 64 * 1024 * 1024


def _resident_spec(shape, single_buffer):
    """BlockSpec for an operand with a constant index_map (VMEM-resident).

    Constant index_maps never re-DMA, so default 2-deep pipelining only doubles
    the VMEM footprint; request a single buffer when the API supports it.
    """
    if single_buffer:
        try:
            return pl.BlockSpec(shape, lambda i: (0, 0),
                                pipeline_mode=pl.Buffered(1))
        except Exception:
            pass
    return pl.BlockSpec(shape, lambda i: (0, 0))


def _make_fused_mlp_kernel(num_layers, out_channels, n_rows, tile_n,
                           mask_cols, mask_rows):
    """Kernel computing the whole MLP for one row tile.

    Ref layout: (x, w_0, b_0, ..., w_{L-1}, b_{L-1}, out)
      x:   [tile_n, in_channels]  original dtype (cast to bf16 in-kernel)
      w_i: [K_i, M_pad_i] bf16    pre-transposed (y = x @ W + b); only the first
                                  layer's K dim is unpadded
      b_i: [1, M_pad_i]   f32
      out: [tile_n, M_out_pad]    log-probabilities; padded lanes/rows are 0
    """

    def kernel(x_ref, *refs):
        o_ref = refs[2 * num_layers]
        h = x_ref[...].astype(jnp.bfloat16)   # activation stays in VMEM
        y = None
        for i in range(num_layers):
            w = refs[2 * i][...]
            b = refs[2 * i + 1][...]
            y = jnp.dot(h, w, preferred_element_type=jnp.float32) + b
            if i < num_layers - 1:
                # relu; dropout is identity in eval mode (training=False).
                h = jnp.maximum(y, 0.0).astype(jnp.bfloat16)

        # Numerically stable log-softmax over the REAL output lanes only.
        if mask_cols:
            col = jax.lax.broadcasted_iota(jnp.int32, y.shape, 1)
            col_ok = col < out_channels
            y = jnp.where(col_ok, y, jnp.float32(-1e30))
        m = jnp.max(y, axis=-1, keepdims=True)
        z = y - m
        e = jnp.exp(z)
        if mask_cols:
            e = jnp.where(col_ok, e, 0.0)
        s = jnp.sum(e, axis=-1, keepdims=True)
        res = z - jnp.log(s)

        # Zero the padding so the padded output is safe to consume directly.
        if mask_cols or mask_rows:
            ok = None
            if mask_cols:
                ok = col_ok
            if mask_rows:
                row = (pl.program_id(0) * tile_n
                       + jax.lax.broadcasted_iota(jnp.int32, y.shape, 0))
                row_ok = row < n_rows
                ok = row_ok if ok is None else jnp.logical_and(ok, row_ok)
            res = jnp.where(ok, res, 0.0)
        o_ref[...] = res.astype(o_ref.dtype)

    return kernel


def prepare_mlp_params(params):
    """Pad / cast the weights & biases ONCE at model-load time.

    params: list of (w, b) per layer; w is [fan_in, fan_out] (already transposed
            vs torch's [out, in]), b is [fan_out].
    Returns (weights, biases, out_channels) with
      weights[i]: bf16 [K_i, M_pad_i]  (K_0 = in_channels, unpadded; later K's
                                        equal the previous padded output dim)
      biases[i]:  f32  [1,  M_pad_i]
    Padded rows/cols/lanes are zero, so padded hidden activations stay exactly
    zero through relu and never perturb the real outputs.
    """
    out_channels = int(params[-1][0].shape[1])
    weights, biases = [], []
    prev_pad = int(params[0][0].shape[0])   # first contraction dim: unpadded
    for (w, b) in params:
        fan_in, fan_out = int(w.shape[0]), int(w.shape[1])
        assert fan_in <= prev_pad
        m_pad = _round_up(fan_out, 128)
        w_p = jnp.zeros((prev_pad, m_pad), jnp.bfloat16)
        w_p = w_p.at[:fan_in, :fan_out].set(w.astype(jnp.bfloat16))
        b_p = jnp.zeros((1, m_pad), jnp.float32)
        b_p = b_p.at[0, :fan_out].set(b.astype(jnp.float32))
        weights.append(w_p)
        biases.append(b_p)
        prev_pad = m_pad
    return tuple(weights), tuple(biases), out_channels


@functools.partial(
    jax.jit,
    static_argnames=("out_channels", "tile_n", "out_dtype", "x_buffers",
                     "single_buffer_params"))
def _fused_mlp_padded(x, weights, biases, *, out_channels, tile_n, out_dtype,
                      x_buffers, single_buffer_params):
    n, in_channels = x.shape
    num_layers = len(weights)
    assert weights[0].shape[0] == in_channels, \
        "x feature dim must match the first (unpadded-K) prepared weight"
    m_out_pad = weights[-1].shape[1]
    m_dims = [w.shape[1] for w in weights]
    k_dims = [w.shape[0] for w in weights]

    # ---- row tiling: large lane-dense tiles, no wrapper-side copy of x ----
    tile_n = max(16, _round_up(int(tile_n), 16))
    if n <= tile_n:
        tile_n = n                      # single block == full dim (always legal)
    grid_n = (n + tile_n - 1) // tile_n
    n_pad = grid_n * tile_n             # only the OUTPUT carries padded rows

    mask_cols = m_out_pad != out_channels
    mask_rows = n_pad != n

    # x / out row tiles march with the grid; weights & biases are VMEM-resident
    # constant blocks (single-buffered).  x may be buffered deeper (v6e) if
    # profiling shows exposed DMA once the output is bf16.
    if x_buffers is not None and int(x_buffers) != 2:
        try:
            x_spec = pl.BlockSpec((tile_n, in_channels), lambda i: (i, 0),
                                  pipeline_mode=pl.Buffered(int(x_buffers)))
        except Exception:
            x_spec = pl.BlockSpec((tile_n, in_channels), lambda i: (i, 0))
    else:
        x_spec = pl.BlockSpec((tile_n, in_channels), lambda i: (i, 0))

    in_specs = [x_spec]
    interleaved = []
    for w_p, b_p in zip(weights, biases):
        in_specs.append(_resident_spec(w_p.shape, single_buffer_params))
        in_specs.append(_resident_spec(b_p.shape, single_buffer_params))
        interleaved += [w_p, b_p]
    out_spec = pl.BlockSpec((tile_n, m_out_pad), lambda i: (i, 0))

    # ---- scheduling hints ----
    flops = int(sum(2 * n_pad * k_dims[i] * m_dims[i] for i in range(num_layers)))
    param_bytes = int(sum(int(a.size) * a.dtype.itemsize
                          for a in (tuple(weights) + tuple(biases))))
    out_itemsize = jnp.dtype(out_dtype).itemsize
    bytes_accessed = int(int(x.size) * x.dtype.itemsize + param_bytes
                         + n_pad * m_out_pad * out_itemsize)
    cost = pl.CostEstimate(flops=flops,
                           transcendentals=int(n_pad * (m_out_pad + 1)),
                           bytes_accessed=bytes_accessed)

    # ---- VMEM budget from the actual buffers, capped per generation ----
    x_tile_bytes = tile_n * in_channels * x.dtype.itemsize
    out_tile_bytes = tile_n * m_out_pad * out_itemsize
    max_feat = max([in_channels] + list(m_dims))
    act_bytes = 6 * tile_n * max_feat * 4          # f32 temporaries headroom
    nx = max(int(x_buffers) if x_buffers else 2, 2)
    nparam = 1 if single_buffer_params else 2
    need = (nx * x_tile_bytes + 2 * out_tile_bytes + nparam * param_bytes
            + act_bytes + (4 << 20))
    vmem_limit = int(min(max(need, 32 << 20),
                         int(0.85 * _physical_vmem_bytes())))

    return pl.pallas_call(
        _make_fused_mlp_kernel(num_layers, out_channels, n, tile_n,
                               mask_cols, mask_rows),
        out_shape=jax.ShapeDtypeStruct((n_pad, m_out_pad), out_dtype),
        grid=(grid_n,),
        in_specs=in_specs,
        out_specs=out_spec,
        compiler_params=pltpu.CompilerParams(
            dimension_semantics=("parallel",),   # megacore sharding on v7x
            vmem_limit_bytes=vmem_limit),
        cost_estimate=cost,
    )(x, *interleaved)


def mlp_forward(x, prepared, *, tile_n=1024, out_dtype=jnp.bfloat16,
                x_buffers=2, unpad=True):
    """Fused MLP forward: hidden (linear+relu) layers + final linear + log_softmax.

    x:        [N, in_channels] float array (cast to bf16 inside the kernel).
    prepared: output of prepare_mlp_params().
    Returns log-probabilities:
      unpad=True  -> [N, out_channels]        (extra slice pass over the output)
      unpad=False -> [N_pad, out_channels_pad] with ZERO padding; preferred for
                     perf-critical consumers that can slice / fuse lazily.
    """
    weights, biases, out_channels = prepared
    kwargs = dict(out_channels=out_channels, tile_n=tile_n,
                  out_dtype=out_dtype, x_buffers=x_buffers)
    try:
        out_pad = _fused_mlp_padded(x, weights, biases,
                                    single_buffer_params=True, **kwargs)
    except Exception:
        # Fallback if this jax build rejects pl.Buffered(1) on TPU inputs.
        out_pad = _fused_mlp_padded(x, weights, biases,
                                    single_buffer_params=False, **kwargs)
    if unpad:
        return out_pad[:x.shape[0], :out_channels]
    return out_pad


def init_mlp_params(key, in_channels, hidden_channels, out_channels, num_layers):
    """Deterministic init mirroring torch.nn.Linear default (uniform +-1/sqrt(fan_in))."""
    dims = [in_channels] + [hidden_channels] * (num_layers - 1) + [out_channels]
    params = []
    for i in range(num_layers):
        key, kw, kb = jax.random.split(key, 3)
        fan_in, fan_out = dims[i], dims[i + 1]
        bound = 1.0 / jnp.sqrt(jnp.float32(fan_in))
        # Stored as [fan_in, fan_out] (already transposed vs torch's [out, in]).
        w = jax.random.uniform(kw, (fan_in, fan_out), jnp.float32, -bound, bound)
        b = jax.random.uniform(kb, (fan_out,), jnp.float32, -bound, bound)
        params.append((w, b))
    return params


if __name__ == "__main__":
    key = jax.random.PRNGKey(0)
    # Small shapes consistent with the module: batch of nodes x feature dim.
    N, in_channels, hidden_channels, out_channels, num_layers = 8, 16, 32, 8, 3
    dropout = 0.5  # eval-mode forward: dropout is identity.
    # TODO(synk): training-mode dropout (F.dropout with training=True) would need
    # in-kernel pltpu.prng_seed / prng_random_bits; not implemented.

    k_x, k_p = jax.random.split(key)
    x = jax.random.normal(k_x, (N, in_channels), jnp.float32)
    params = init_mlp_params(k_p, in_channels, hidden_channels, out_channels,
                             num_layers)
    prepared = prepare_mlp_params(params)   # pad/cast once at load time

    # Padded (zero-filled) fast path; consumer slices lazily.
    out_pad = mlp_forward(x, prepared, unpad=False)
    out_pad = jax.block_until_ready(out_pad)
    out = jnp.asarray(out_pad[:N, :out_channels], jnp.float32)
    assert out.shape == (N, out_channels)

    # Padded region must be exactly zero (safe to consume padded output).
    if out_pad.shape[1] > out_channels:
        assert jnp.all(out_pad[:, out_channels:] == 0), "padded cols not zero"
    if out_pad.shape[0] > N:
        assert jnp.all(out_pad[N:, :] == 0), "padded rows not zero"

    # Reference 1: mirrors kernel numerics (bf16 matmul operands, f32 accum;
    # small extra slack for the bf16 output store).
    h = x.astype(jnp.bfloat16)
    y = None
    for i, (w, b) in enumerate(params):
        y = jnp.dot(h, w.astype(jnp.bfloat16),
                    preferred_element_type=jnp.float32) + b
        if i < num_layers - 1:
            h = jnp.maximum(y, 0.0).astype(jnp.bfloat16)
    ref_bf16 = jax.nn.log_softmax(y, axis=-1)
    assert jnp.allclose(out, ref_bf16, atol=0.1, rtol=0.02), \
        "mismatch vs bf16-mirroring reference"

    # Reference 2: pure-f32 module semantics (loose tolerance = bf16 error budget).
    ref = x
    for i, (w, b) in enumerate(params):
        ref = ref @ w + b
        if i < num_layers - 1:
            ref = jnp.maximum(ref, 0.0)
    ref = jax.nn.log_softmax(ref, axis=-1)
    assert jnp.allclose(out, ref, atol=0.25, rtol=0.05), \
        "mismatch vs f32 reference"

    print("KERNEL_OK")
</pallas_src>

<mosaic_0001>
module attributes {stable_mosaic.version = 11 : i64} {
  func.func @kernel(%arg0: i32, %arg1: memref<8x16xf32, #tpu.memory_space<vmem>>, %arg2: memref<16x128xbf16, #tpu.memory_space<vmem>>, %arg3: memref<1x128xf32, #tpu.memory_space<vmem>>, %arg4: memref<128x128xbf16, #tpu.memory_space<vmem>>, %arg5: memref<1x128xf32, #tpu.memory_space<vmem>>, %arg6: memref<128x128xbf16, #tpu.memory_space<vmem>>, %arg7: memref<1x128xf32, #tpu.memory_space<vmem>>, %arg8: memref<8x128xbf16, #tpu.memory_space<vmem>>) attributes {dimension_semantics = [#tpu.dimension_semantics<parallel>], iteration_bounds = array<i64: 1>, scalar_prefetch = 0 : i64, scratch_operands = 0 : i64, tpu.core_type = #tpu.core_type<tc>, window_params = [{transform_indices = @transform_0, window_bounds = array<i64: 8, 16>}, {pipeline_mode = #tpu.pipeline_mode<synchronous>, transform_indices = @transform_1, window_bounds = array<i64: 16, 128>}, {pipeline_mode = #tpu.pipeline_mode<synchronous>, transform_indices = @transform_2, window_bounds = array<i64: 1, 128>}, {pipeline_mode = #tpu.pipeline_mode<synchronous>, transform_indices = @transform_3, window_bounds = array<i64: 128, 128>}, {pipeline_mode = #tpu.pipeline_mode<synchronous>, transform_indices = @transform_4, window_bounds = array<i64: 1, 128>}, {pipeline_mode = #tpu.pipeline_mode<synchronous>, transform_indices = @transform_5, window_bounds = array<i64: 128, 128>}, {pipeline_mode = #tpu.pipeline_mode<synchronous>, transform_indices = @transform_6, window_bounds = array<i64: 1, 128>}, {transform_indices = @transform_7, window_bounds = array<i64: 8, 128>}]} {
    %c0 = arith.constant 0 : index
    %c0_0 = arith.constant 0 : index
    %0 = vector.load %arg1[%c0, %c0_0] : memref<8x16xf32, #tpu.memory_space<vmem>>, vector<8x16xf32>
    %1 = arith.truncf %0 : vector<8x16xf32> to vector<8x16xbf16>
    %c0_1 = arith.constant 0 : index
    %c0_2 = arith.constant 0 : index
    %2 = vector.load %arg2[%c0_1, %c0_2] : memref<16x128xbf16, #tpu.memory_space<vmem>>, vector<16x128xbf16>
    %c0_3 = arith.constant 0 : index
    %c0_4 = arith.constant 0 : index
    %3 = vector.load %arg3[%c0_3, %c0_4] : memref<1x128xf32, #tpu.memory_space<vmem>>, vector<1x128xf32>
    %cst = arith.constant dense<0.000000e+00> : vector<8x128xf32>
    %4 = tpu.matmul %1, %2, %cst {dimension_numbers = #tpu.dot_dimension_numbers<[1], [0], [0], [1], [0, 0, 1, 1], [], []>} : vector<8x16xbf16>, vector<16x128xbf16>, vector<8x128xf32> -> vector<8x128xf32>
    %5 = vector.broadcast %3 : vector<1x128xf32> to vector<8x128xf32>
    %6 = arith.addf %4, %5 : vector<8x128xf32>
    %cst_5 = arith.constant 0.000000e+00 : f32
    %7 = vector.broadcast %cst_5 : f32 to vector<8x128xf32>
    %8 = arith.maximumf %6, %7 : vector<8x128xf32>
    %9 = arith.truncf %8 : vector<8x128xf32> to vector<8x128xbf16>
    %c0_6 = arith.constant 0 : index
    %c0_7 = arith.constant 0 : index
    %10 = vector.load %arg4[%c0_6, %c0_7] : memref<128x128xbf16, #tpu.memory_space<vmem>>, vector<128x128xbf16>
    %c0_8 = arith.constant 0 : index
    %c0_9 = arith.constant 0 : index
    %11 = vector.load %arg5[%c0_8, %c0_9] : memref<1x128xf32, #tpu.memory_space<vmem>>, vector<1x128xf32>
    %cst_10 = arith.constant dense<0.000000e+00> : vector<8x128xf32>
    %12 = tpu.matmul %9, %10, %cst_10 {dimension_numbers = #tpu.dot_dimension_numbers<[1], [0], [0], [1], [0, 0, 1, 1], [], []>} : vector<8x128xbf16>, vector<128x128xbf16>, vector<8x128xf32> -> vector<8x128xf32>
    %13 = vector.broadcast %11 : vector<1x128xf32> to vector<8x128xf32>
    %14 = arith.addf %12, %13 : vector<8x128xf32>
    %cst_11 = arith.constant 0.000000e+00 : f32
    %15 = vector.broadcast %cst_11 : f32 to vector<8x128xf32>
    %16 = arith.maximumf %14, %15 : vector<8x128xf32>
    %17 = arith.truncf %16 : vector<8x128xf32> to vector<8x128xbf16>
    %c0_12 = arith.constant 0 : index
    %c0_13 = arith.constant 0 : index
    %18 = vector.load %arg6[%c0_12, %c0_13] : memref<128x128xbf16, #tpu.memory_space<vmem>>, vector<128x128xbf16>
    %c0_14 = arith.constant 0 : index
    %c0_15 = arith.constant 0 : index
    %19 = vector.load %arg7[%c0_14, %c0_15] : memref<1x128xf32, #tpu.memory_space<vmem>>, vector<1x128xf32>
    %cst_16 = arith.constant dense<0.000000e+00> : vector<8x128xf32>
    %20 = tpu.matmul %17, %18, %cst_16 {dimension_numbers = #tpu.dot_dimension_numbers<[1], [0], [0], [1], [0, 0, 1, 1], [], []>} : vector<8x128xbf16>, vector<128x128xbf16>, vector<8x128xf32> -> vector<8x128xf32>
    %21 = vector.broadcast %19 : vector<1x128xf32> to vector<8x128xf32>
    %22 = arith.addf %20, %21 : vector<8x128xf32>
    %23 = tpu.iota {dimensions = array<i32: 1>} : vector<8x128xi32>
    %c8_i32 = arith.constant 8 : i32
    %24 = vector.broadcast %c8_i32 : i32 to vector<8x128xi32>
    %25 = arith.cmpi slt, %23, %24 : vector<8x128xi32>
    %cst_17 = arith.constant -1.000000e+30 : f32
    %26 = vector.broadcast %cst_17 : f32 to vector<8x128xf32>
    %27 = arith.select %25, %22, %26 : vector<8x128xi1>, vector<8x128xf32>
    %cst_18 = arith.constant dense<0xFF800000> : vector<8xf32>
    %28 = vector.multi_reduction <maximumf>, %27, %cst_18 [1] : vector<8x128xf32> to vector<8xf32>
    %29 = vector.shape_cast %28 : vector<8xf32> to vector<8x1xf32>
    %30 = vector.broadcast %29 : vector<8x1xf32> to vector<8x128xf32>
    %31 = arith.subf %27, %30 : vector<8x128xf32>
    %32 = math.exp %31 : vector<8x128xf32>
    %cst_19 = arith.constant 0.000000e+00 : f32
    %33 = vector.broadcast %cst_19 : f32 to vector<8x128xf32>
    %34 = arith.select %25, %32, %33 : vector<8x128xi1>, vector<8x128xf32>
    %cst_20 = arith.constant dense<0.000000e+00> : vector<8xf32>
    %35 = vector.multi_reduction <add>, %34, %cst_20 [1] : vector<8x128xf32> to vector<8xf32>
    %36 = vector.shape_cast %35 : vector<8xf32> to vector<8x1xf32>
    %37 = math.log %36 : vector<8x1xf32>
    %38 = vector.broadcast %37 : vector<8x1xf32> to vector<8x128xf32>
    %39 = arith.subf %31, %38 : vector<8x128xf32>
    %cst_21 = arith.constant 0.000000e+00 : f32
    %40 = vector.broadcast %cst_21 : f32 to vector<8x128xf32>
    %41 = arith.select %25, %39, %40 : vector<8x128xi1>, vector<8x128xf32>
    %42 = arith.truncf %41 : vector<8x128xf32> to vector<8x128xbf16>
    %c0_22 = arith.constant 0 : index
    %c0_23 = arith.constant 0 : index
    %43 = vector.load %arg8[%c0_22, %c0_23] : memref<8x128xbf16, #tpu.memory_space<vmem>>, vector<8x128xbf16>
    tpu.vector_store %arg8[%c0_22, %c0_23], %42 {strides = array<i32>} : memref<8x128xbf16, #tpu.memory_space<vmem>>, vector<8x128xbf16>,
    return
  }
  func.func @transform_0(%arg0: i32) -> (i32, i32) {
    %c0_i32 = arith.constant 0 : i32
    %c0_i32_0 = arith.constant 0 : i32
    return %arg0, %c0_i32 : i32, i32
  }
  func.func @transform_1(%arg0: i32) -> (i32, i32) {
    %c0_i32 = arith.constant 0 : i32
    %c0_i32_0 = arith.constant 0 : i32
    %c0_i32_1 = arith.constant 0 : i32
    return %c0_i32, %c0_i32_0 : i32, i32
  }
  func.func @transform_2(%arg0: i32) -> (i32, i32) {
    %c0_i32 = arith.constant 0 : i32
    %c0_i32_0 = arith.constant 0 : i32
    %c0_i32_1 = arith.constant 0 : i32
    return %c0_i32, %c0_i32_0 : i32, i32
  }
  func.func @transform_3(%arg0: i32) -> (i32, i32) {
    %c0_i32 = arith.constant 0 : i32
    %c0_i32_0 = arith.constant 0 : i32
    %c0_i32_1 = arith.constant 0 : i32
    return %c0_i32, %c0_i32_0 : i32, i32
  }
  func.func @transform_4(%arg0: i32) -> (i32, i32) {
    %c0_i32 = arith.constant 0 : i32
    %c0_i32_0 = arith.constant 0 : i32
    %c0_i32_1 = arith.constant 0 : i32
    return %c0_i32, %c0_i32_0 : i32, i32
  }
  func.func @transform_5(%arg0: i32) -> (i32, i32) {
    %c0_i32 = arith.constant 0 : i32
    %c0_i32_0 = arith.constant 0 : i32
    %c0_i32_1 = arith.constant 0 : i32
    return %c0_i32, %c0_i32_0 : i32, i32
  }
  func.func @transform_6(%arg0: i32) -> (i32, i32) {
    %c0_i32 = arith.constant 0 : i32
    %c0_i32_0 = arith.constant 0 : i32
    %c0_i32_1 = arith.constant 0 : i32
    return %c0_i32, %c0_i32_0 : i32, i32
  }
  func.func @transform_7(%arg0: i32) -> (i32, i32) {
    %c0_i32 = arith.constant 0 : i32
    %c0_i32_0 = arith.constant 0 : i32
    return %arg0, %c0_i32 : i32, i32
  }
}

module attributes {stable_mosaic.version = 11 : i64} {
  func.func @kernel(%arg0: i32, %arg1: memref<8x16xf32, #tpu.memory_space<vmem>>, %arg2: memref<16x128xbf16, #tpu.memory_space<vmem>>, %arg3: memref<1x128xf32, #tpu.memory_space<vmem>>, %arg4: memref<128x128xbf16, #tpu.memory_space<vmem>>, %arg5: memref<1x128xf32, #tpu.memory_space<vmem>>, %arg6: memref<128x128xbf16, #tpu.memory_space<vmem>>, %arg7: memref<1x128xf32, #tpu.memory_space<vmem>>, %arg8: memref<8x128xbf16, #tpu.memory_space<vmem>>) attributes {dimension_semantics = [#tpu.dimension_semantics<parallel>], iteration_bounds = array<i64: 1>, scalar_prefetch = 0 : i64, scratch_operands = 0 : i64, tpu.core_type = #tpu.core_type<tc>, window_params = [{transform_indices = @transform_0, window_bounds = array<i64: 8, 16>}, {pipeline_mode = #tpu.pipeline_mode<synchronous>, transform_indices = @transform_1, window_bounds = array<i64: 16, 128>}, {pipeline_mode = #tpu.pipeline_mode<synchronous>, transform_indices = @transform_2, window_bounds = array<i64: 1, 128>}, {pipeline_mode = #tpu.pipeline_mode<synchronous>, transform_indices = @transform_3, window_bounds = array<i64: 128, 128>}, {pipeline_mode = #tpu.pipeline_mode<synchronous>, transform_indices = @transform_4, window_bounds = array<i64: 1, 128>}, {pipeline_mode = #tpu.pipeline_mode<synchronous>, transform_indices = @transform_5, window_bounds = array<i64: 128, 128>}, {pipeline_mode = #tpu.pipeline_mode<synchronous>, transform_indices = @transform_6, window_bounds = array<i64: 1, 128>}, {transform_indices = @transform_7, window_bounds = array<i64: 8, 128>}]} {
    %c0 = arith.constant 0 : index
    %c0_0 = arith.constant 0 : index
    %0 = vector.load %arg1[%c0, %c0_0] : memref<8x16xf32, #tpu.memory_space<vmem>>, vector<8x16xf32>
    %1 = arith.truncf %0 : vector<8x16xf32> to vector<8x16xbf16>
    %c0_1 = arith.constant 0 : index
    %c0_2 = arith.constant 0 : index
    %2 = vector.load %arg2[%c0_1, %c0_2] : memref<16x128xbf16, #tpu.memory_space<vmem>>, vector<16x128xbf16>
    %c0_3 = arith.constant 0 : index
    %c0_4 = arith.constant 0 : index
    %3 = vector.load %arg3[%c0_3, %c0_4] : memref<1x128xf32, #tpu.memory_space<vmem>>, vector<1x128xf32>
    %cst = arith.constant dense<0.000000e+00> : vector<8x128xf32>
    %4 = tpu.matmul %1, %2, %cst {dimension_numbers = #tpu.dot_dimension_numbers<[1], [0], [0], [1], [0, 0, 1, 1], [], []>} : vector<8x16xbf16>, vector<16x128xbf16>, vector<8x128xf32> -> vector<8x128xf32>
    %5 = vector.broadcast %3 : vector<1x128xf32> to vector<8x128xf32>
    %6 = arith.addf %4, %5 : vector<8x128xf32>
    %cst_5 = arith.constant 0.000000e+00 : f32
    %7 = vector.broadcast %cst_5 : f32 to vector<8x128xf32>
    %8 = arith.maximumf %6, %7 : vector<8x128xf32>
    %9 = arith.truncf %8 : vector<8x128xf32> to vector<8x128xbf16>
    %c0_6 = arith.constant 0 : index
    %c0_7 = arith.constant 0 : index
    %10 = vector.load %arg4[%c0_6, %c0_7] : memref<128x128xbf16, #tpu.memory_space<vmem>>, vector<128x128xbf16>
    %c0_8 = arith.constant 0 : index
    %c0_9 = arith.constant 0 : index
    %11 = vector.load %arg5[%c0_8, %c0_9] : memref<1x128xf32, #tpu.memory_space<vmem>>, vector<1x128xf32>
    %cst_10 = arith.constant dense<0.000000e+00> : vector<8x128xf32>
    %12 = tpu.matmul %9, %10, %cst_10 {dimension_numbers = #tpu.dot_dimension_numbers<[1], [0], [0], [1], [0, 0, 1, 1], [], []>} : vector<8x128xbf16>, vector<128x128xbf16>, vector<8x128xf32> -> vector<8x128xf32>
    %13 = vector.broadcast %11 : vector<1x128xf32> to vector<8x128xf32>
    %14 = arith.addf %12, %13 : vector<8x128xf32>
    %cst_11 = arith.constant 0.000000e+00 : f32
    %15 = vector.broadcast %cst_11 : f32 to vector<8x128xf32>
    %16 = arith.maximumf %14, %15 : vector<8x128xf32>
    %17 = arith.truncf %16 : vector<8x128xf32> to vector<8x128xbf16>
    %c0_12 = arith.constant 0 : index
    %c0_13 = arith.constant 0 : index
    %18 = vector.load %arg6[%c0_12, %c0_13] : memref<128x128xbf16, #tpu.memory_space<vmem>>, vector<128x128xbf16>
    %c0_14 = arith.constant 0 : index
    %c0_15 = arith.constant 0 : index
    %19 = vector.load %arg7[%c0_14, %c0_15] : memref<1x128xf32, #tpu.memory_space<vmem>>, vector<1x128xf32>
    %cst_16 = arith.constant dense<0.000000e+00> : vector<8x128xf32>
    %20 = tpu.matmul %17, %18, %cst_16 {dimension_numbers = #tpu.dot_dimension_numbers<[1], [0], [0], [1], [0, 0, 1, 1], [], []>} : vector<8x128xbf16>, vector<128x128xbf16>, vector<8x128xf32> -> vector<8x128xf32>
    %21 = vector.broadcast %19 : vector<1x128xf32> to vector<8x128xf32>
    %22 = arith.addf %20, %21 : vector<8x128xf32>
    %23 = tpu.iota {dimensions = array<i32: 1>} : vector<8x128xi32>
    %c8_i32 = arith.constant 8 : i32
    %24 = vector.broadcast %c8_i32 : i32 to vector<8x128xi32>
    %25 = arith.cmpi slt, %23, %24 : vector<8x128xi32>
    %cst_17 = arith.constant -1.000000e+30 : f32
    %26 = vector.broadcast %cst_17 : f32 to vector<8x128xf32>
    %27 = arith.select %25, %22, %26 : vector<8x128xi1>, vector<8x128xf32>
    %cst_18 = arith.constant dense<0xFF800000> : vector<8xf32>
    %28 = vector.multi_reduction <maximumf>, %27, %cst_18 [1] : vector<8x128xf32> to vector<8xf32>
    %29 = vector.shape_cast %28 : vector<8xf32> to vector<8x1xf32>
    %30 = vector.broadcast %29 : vector<8x1xf32> to vector<8x128xf32>
    %31 = arith.subf %27, %30 : vector<8x128xf32>
    %32 = math.exp %31 : vector<8x128xf32>
    %cst_19 = arith.constant 0.000000e+00 : f32
    %33 = vector.broadcast %cst_19 : f32 to vector<8x128xf32>
    %34 = arith.select %25, %32, %33 : vector<8x128xi1>, vector<8x128xf32>
    %cst_20 = arith.constant dense<0.000000e+00> : vector<8xf32>
    %35 = vector.multi_reduction <add>, %34, %cst_20 [1] : vector<8x128xf32> to vector<8xf32>
    %36 = vector.shape_cast %35 : vector<8xf32> to vector<8x1xf32>
    %37 = math.log %36 : vector<8x1xf32>
    %38 = vector.broadcast %37 : vector<8x1xf32> to vector<8x128xf32>
    %39 = arith.subf %31, %38 : vector<8x128xf32>
    %cst_21 = arith.constant 0.000000e+00 : f32
    %40 = vector.broadcast %cst_21 : f32 to vector<8x128xf32>
    %41 = arith.select %25, %39, %40 : vector<8x128xi1>, vector<8x128xf32>
    %42 = arith.truncf %41 : vector<8x128xf32> to vector<8x128xbf16>
    %c0_22 = arith.constant 0 : index
    %c0_23 = arith.constant 0 : index
    %43 = vector.load %arg8[%c0_22, %c0_23] : memref<8x128xbf16, #tpu.memory_space<vmem>>, vector<8x128xbf16>
    tpu.vector_store %arg8[%c0_22, %c0_23], %42 {strides = array<i32>} : memref<8x128xbf16, #tpu.memory_space<vmem>>, vector<8x128xbf16>,
    return
  }
  func.func @transform_0(%arg0: i32) -> (i32, i32) {
    %c0_i32 = arith.constant 0 : i32
    %c0_i32_0 = arith.constant 0 : i32
    return %arg0, %c0_i32 : i32, i32
  }
  func.func @transform_1(%arg0: i32) -> (i32, i32) {
    %c0_i32 = arith.constant 0 : i32
    %c0_i32_0 = arith.constant 0 : i32
    %c0_i32_1 = arith.constant 0 : i32
    return %c0_i32, %c0_i32_0 : i32, i32
  }
  func.func @transform_2(%arg0: i32) -> (i32, i32) {
    %c0_i32 = arith.constant 0 : i32
    %c0_i32_0 = arith.constant 0 : i32
    %c0_i32_1 = arith.constant 0 : i32
    return %c0_i32, %c0_i32_0 : i32, i32
  }
  func.func @transform_3(%arg0: i32) -> (i32, i32) {
    %c0_i32 = arith.constant 0 : i32
    %c0_i32_0 = arith.constant 0 : i32
    %c0_i32_1 = arith.constant 0 : i32
    return %c0_i32, %c0_i32_0 : i32, i32
  }
  func.func @transform_4(%arg0: i32) -> (i32, i32) {
    %c0_i32 = arith.constant 0 : i32
    %c0_i32_0 = arith.constant 0 : i32
    %c0_i32_1 = arith.constant 0 : i32
    return %c0_i32, %c0_i32_0 : i32, i32
  }
  func.func @transform_5(%arg0: i32) -> (i32, i32) {
    %c0_i32 = arith.constant 0 : i32
    %c0_i32_0 = arith.constant 0 : i32
    %c0_i32_1 = arith.constant 0 : i32
    return %c0_i32, %c0_i32_0 : i32, i32
  }
  func.func @transform_6(%arg0: i32) -> (i32, i32) {
    %c0_i32 = arith.constant 0 : i32
    %c0_i32_0 = arith.constant 0 : i32
    %c0_i32_1 = arith.constant 0 : i32
    return %c0_i32, %c0_i32_0 : i32, i32
  }
  func.func @transform_7(%arg0: i32) -> (i32, i32) {
    %c0_i32 = arith.constant 0 : i32
    %c0_i32_0 = arith.constant 0 : i32
    return %arg0, %c0_i32 : i32, i32
  }
}

</mosaic_0001>

<bundles_post_ra>
// kernel: _fused_mlp_padded.1
= control target key start
LH: loop header
LB: loop body
LE: loop exit
PB: predicated region body
PF: predicated region fallthrough
CT: control target
= control target key end

     0   :  { %12 = vsyncpa [#allocation3], 0  ;;  %s625_s0 = inlined_call_operand.hbm [shape: f32[8,16], index: 0, kind: input, shape index: {}]   ;;  %s626_s1 = inlined_call_operand.hbm [shape: bf16[16,128], index: 1, kind: input, shape index: {}]   ;;  %s627_s2 = inlined_call_operand.vmem [shape: f32[1,128], index: 2, kind: input, shape index: {}]   ;;  %s628_s3 = inlined_call_operand.hbm [shape: bf16[128,128], index: 3, kind: input, shape index: {}]   ;;  %s629_s4 = inlined_call_operand.vmem [shape: f32[1,128], index: 4, kind: input, shape index: {}]   ;;  %s630_s5 = inlined_call_operand.hbm [shape: bf16[128,128], index: 5, kind: input, shape index: {}]   ;;  %s631_s6 = inlined_call_operand.vmem [shape: f32[1,128], index: 6, kind: input, shape index: {}]   ;;  %s632_s7 = inlined_call_operand.hbm [shape: bf16[8,128], index: 7, kind: output, shape index: {}]  }
   0x1   :  { %13 = vsyncpa [#allocation6], 0 }
   0x2   :  { %14 = vsyncpa [#allocation9], 0  ;;  %s31_s26 = sshll.u32 %s626_s1, 4  ;;  %s32_s26 = int_to_ptr.hbm [resolvable:$true] %s31_s26 }
   0x3   :  { %15 = vsyncpa [#allocation4], 0  ;;  %s551_s27 = smov [#allocation5]   ;;  %s21_s8 = sshll.u32 %s625_s0, 4  ;;  %s22_s8 = int_to_ptr.hbm [resolvable:$true] %s21_s8 }
   0x4   :  { %s33_s28 = sshll.u32 %s551_s27, 4  ;;  %s552_s9 = smov 64   ;;  %s34_s28 = int_to_ptr.vmem [resolvable:$true] %s33_s28 }
   0x5   :  { %s553_s10 = smov 4   ;;  %s554_s11 = smov [#allocation2]  }
   0x6   :  { %39 = dma.hbm_to_vmem [thread:$0]  %s32_s26, 128, %s34_s28, [#allocation6], %s552_s9, %s552_s9, %s553_s10  }
   0x7   :  { %s23_s12 = sshll.u32 %s554_s11, 4  ;;  %s46_s15 = sshll.u32 %s628_s3, 4  ;;  %s24_s12 = int_to_ptr.vmem [resolvable:$true] %s23_s12  ;;  %s47_s15 = int_to_ptr.hbm [resolvable:$true] %s46_s15 }
   0x8   :  { %26 = dma.hbm_to_vmem [thread:$0]  %s22_s8, 128, %s24_s12, [#allocation3]  }
   0x9   :  { %s61_s17 = sshll.u32 %s630_s5, 4  ;;  %s555_s18 = smov [#allocation7]   ;;  %s62_s17 = int_to_ptr.hbm [resolvable:$true] %s61_s17 }
   0xa   :  { %s48_s19 = sshll.u32 %s555_s18, 4  ;;  %s556_s0 = smov [#allocation8]   ;;  %s49_s19 = int_to_ptr.vmem [resolvable:$true] %s48_s19 }
   0xb   :  { %54 = dma.hbm_to_vmem [thread:$0]  %s47_s15, 1024, %s49_s19, [#allocation6], %s552_s9, %s552_s9, %s553_s10  }
   0xc   :  { %s63_s20 = sshll.u32 %s556_s0, 4  ;;  %s64_s20 = int_to_ptr.vmem [resolvable:$true] %s63_s20 }
   0xd   :  { %69 = dma.hbm_to_vmem [thread:$0]  %s62_s17, 1024, %s64_s20, [#allocation9], %s552_s9, %s552_s9, %s553_s10  }
   0xe   :  { %543 = dma.done.wait [#allocation3], 128  }
   0xf   :  { %544 = vsyncadd [#allocation3], 4294967168 }
  0x10   :  { %545 = dma.done.wait [#allocation6], 1152  }
  0x11   :  { %546 = vsyncadd [#allocation6], 4294966144 }
  0x12   :  { %547 = dma.done.wait [#allocation9], 1024  }
  0x13   :  { %548 = vsyncadd [#allocation9], 4294966272  ;;  %v392_v0 = vld [vmem:[#allocation5] sm:$0xff]  ;;  %v89_v1 = vld [vmem:[#allocation2] sm:$0xff]  ;;  %vm103_vm0 = vcmask 130048   ;;  %v286_v31 = vlaneseq  ;;  %s311_s26 = sshll.u32 %s632_s7, 4  ;;  %s312_s26 = int_to_ptr.hbm [resolvable:$true] %s311_s26 }
  0x14   :  { %v400_v2 = vld [vmem:[#allocation7 + $0x38] sm:$0xff]  ;;  %v90_v3 = vpack.c.bf16 %v89_v1, %v89_v1  ;;  %114 = vmatpush.bf16.msra.mxu0 %v392_v0  ;;  %v399_v4 = vld [vmem:[#allocation7 + $0x30] sm:$0xff]  ;;  %v398_v5 = vld [vmem:[#allocation7 + $0x28] sm:$0xff] }
  0x15   :  { %190 = vmatpush.bf16.msra.mxu1 %v400_v2  ;;  %v397_v6 = vld [vmem:[#allocation7 + $0x20] sm:$0xff]  ;;  %v396_v7 = vld [vmem:[#allocation7 + $0x18] sm:$0xff]  ;;  %v395_v8 = vld [vmem:[#allocation7 + $0x10] sm:$0xff]  ;;  %v287_v32 = vand.u32 127, %v286_v31 }
  0x16   :  { %v394_v9 = vld [vmem:[#allocation7 + $0x8] sm:$0xff]  ;;  %v393_v10 = vld [vmem:[#allocation7] sm:$0xff]  ;;  %v408_v11 = vld [vmem:[#allocation8 + $0x38] sm:$0xff] }
  0x17   :  { %327 = vmatmul.msk.bf16.vlgmr.msra.gmra.mxu0 %vm103_vm0, %v90_v3  ;;  %273 = vmatpush.bf16.msra.mxu2 %v408_v11  ;;  %v407_v12 = vld [vmem:[#allocation8 + $0x30] sm:$0xff]  ;;  %v406_v13 = vld [vmem:[#allocation8 + $0x28] sm:$0xff]  ;;  %v405_v14 = vld [vmem:[#allocation8 + $0x20] sm:$0xff]  ;;  %vm288_vm1 = vcmp.lt.s32.totalorder %v287_v32, 8 }
  0x18   :  { %v404_v15 = vld [vmem:[#allocation8 + $0x18] sm:$0xff]  ;;  %v403_v16 = vld [vmem:[#allocation8 + $0x10] sm:$0xff]  ;;  %v402_v23 = vld [vmem:[#allocation8 + $0x8] sm:$0xff] }
  0x19   :  { %191 = vmatpush.bf16.msra.mxu1 %v399_v4  ;;  %v416_v17 = vld [vmem:[%s627_s2] ss:$0 sm:$0xff]  ;;  %v401_v24 = vld [vmem:[#allocation8] sm:$0xff] }
  0x1a   :  { %v417_v25 = vld [vmem:[%s629_s4] ss:$0 sm:$0xff]  ;;  %s557_s4 = smov [#allocation10]  }
  0x1b   :  { %274 = vmatpush.bf16.msra.mxu2 %v407_v12  ;;  %v418_v33 = vld [vmem:[%s631_s6] ss:$0 sm:$0xff]  ;;  %s309_s6 = sshll.u32 %s557_s4, 4  ;;  %s310_s6 = int_to_ptr.vmem [resolvable:$true] %s309_s6 }
  0x1d   :  { %192 = vmatpush.bf16.msra.mxu1 %v398_v5 }
  0x1f   :  { %275 = vmatpush.bf16.msra.mxu2 %v406_v13 }
  0x21   :  { %193 = vmatpush.bf16.msra.mxu1 %v397_v6 }
  0x23   :  { %276 = vmatpush.bf16.msra.mxu2 %v405_v14 }
  0x25   :  { %194 = vmatpush.bf16.msra.mxu1 %v396_v7 }
  0x27   :  { %277 = vmatpush.bf16.msra.mxu2 %v404_v15 }
  0x29   :  { %195 = vmatpush.bf16.msra.mxu1 %v395_v8 }
  0x2b   :  { %278 = vmatpush.bf16.msra.mxu2 %v403_v16 }
  0x2d   :  { %196 = vmatpush.bf16.msra.mxu1 %v394_v9 }
  0x2f   :  { %279 = vmatpush.bf16.msra.mxu2 %v402_v23 }
  0x31   :  { %197 = vmatpush.bf16.msra.mxu1 %v393_v10 }
  0x33   :  { %280 = vmatpush.bf16.msra.mxu2 %v401_v24 }
  0x94   :  { %v116_v18 = vpop.f32.mrf.mxu0 }
  0x95   :  { %v117_v19 = vadd.f32 %v416_v17, %v116_v18 }
  0x97   :  { %v120_v20 = vmax.f32 %v117_v19, 0.0 }
  0x99   :  { %v121_v21 = vpack.c.bf16 %v120_v20, %v120_v20 }
  0x9b   :  { %198 = vmatmul.bf16.vlgmr.msra.gmra.mxu1 %v121_v21 }
  0x9c   :  { %v118_v22 = vpop.f32.mrf.mxu0 }
 0x118   :  { %v199_v26 = vpop.f32.mrf.mxu1 }
 0x119   :  { %v200_v27 = vadd.f32 %v417_v25, %v199_v26 }
 0x11b   :  { %v203_v28 = vmax.f32 %v200_v27, 0.0 }
 0x11d   :  { %v204_v29 = vpack.c.bf16 %v203_v28, %v203_v28 }
 0x11f   :  { %281 = vmatmul.bf16.vlgmr.msra.gmra.mxu2 %v204_v29 }
 0x120   :  { %v201_v30 = vpop.f32.mrf.mxu1 }
 0x1a2   :  { %v282_v34 = vpop.f32.mrf.mxu2 }
 0x1a3   :  { %v283_v35 = vadd.f32 %v418_v33, %v282_v34 }
 0x1a5   :  { %v289_v36 = vsel %vm288_vm1, %v283_v35, -1e+30 }
 0x1a6   :  { %290 = vmax.xlane.f32.xlu0 %v289_v36 }
 0x1aa   :  { %v284_v37 = vpop.f32.mrf.mxu2 }
 0x219   :  { %v291_v38 = vpop.xlane.xlu0 %290 }
 0x21a   :  { %v292_v39 = vsub.f32 %v289_v36, %v291_v38 }
 0x21c   :  { %v293_v40 = vmul.f32 1.442695, %v292_v39 }
 0x21e   :  { %419 = vpow2.f32 %v293_v40 }
 0x224   :  { %v420_v41 = vpop.eup %419 }
 0x225   :  { %v295_v42 = vsel %vm288_vm1, %v420_v41, 0.0 }
 0x226   :  { %296 = vadd.xlane.f32.xlu0 %v295_v42 }
 0x299   :  { %v297_v43 = vpop.xlane.xlu0 %296 }
 0x29a   :  { %421 = vlog2.f32 %v297_v43 }
 0x2a0   :  { %v422_v44 = vpop.eup %421 }
 0x2a1   :  { %v299_v45 = vmul.f32 0.6931472, %v422_v44 }
 0x2a3   :  { %v300_v46 = vsub.f32 %v292_v39, %v299_v45 }
 0x2a5   :  { %v301_v47 = vsel %vm288_vm1, %v300_v46, 0.0 }
 0x2a6   :  { %v302_v48 = vpack.c.bf16 %v301_v47, %v301_v47 }
 0x2a8   :  { %303 = vst [vmem:[#allocation10] sm:$0xf] %v302_v48 }
 0x2a9   :  { %314 = dma.vmem_to_hbm [thread:$0]  %s310_s6, 64, %s312_s26, [#allocation4]  }
 0x2aa   :  { %549 = dma.done.wait [#allocation4], 64  }
 0x2ab   :  { %550 = vsyncadd [#allocation4], 4294967232 }
 0x2ac   :  { %319 = vsyncpa [#allocation3], 1 }
 0x2ad   :  { %320 = vsyncpa [#allocation6], 1 }
 0x2ae   :  { %321 = vsyncpa [#allocation9], 1 }
 0x2af   :  { %322 = vsyncpa [#allocation4], 1 }

// kernel: _fused_mlp_padded.1
= control target key start
LH: loop header
LB: loop body
LE: loop exit
PB: predicated region body
PF: predicated region fallthrough
CT: control target
= control target key end

     0   :  { %12 = vsyncpa [#allocation3], 0  ;;  %s625_s0 = inlined_call_operand.hbm [shape: f32[8,16], index: 0, kind: input, shape index: {}]   ;;  %s626_s1 = inlined_call_operand.hbm [shape: bf16[16,128], index: 1, kind: input, shape index: {}]   ;;  %s627_s2 = inlined_call_operand.vmem [shape: f32[1,128], index: 2, kind: input, shape index: {}]   ;;  %s628_s3 = inlined_call_operand.hbm [shape: bf16[128,128], index: 3, kind: input, shape index: {}]   ;;  %s629_s4 = inlined_call_operand.vmem [shape: f32[1,128], index: 4, kind: input, shape index: {}]   ;;  %s630_s5 = inlined_call_operand.hbm [shape: bf16[128,128], index: 5, kind: input, shape index: {}]   ;;  %s631_s6 = inlined_call_operand.vmem [shape: f32[1,128], index: 6, kind: input, shape index: {}]   ;;  %s632_s7 = inlined_call_operand.hbm [shape: bf16[8,128], index: 7, kind: output, shape index: {}]  }
   0x1   :  { %13 = vsyncpa [#allocation6], 0 }
   0x2   :  { %14 = vsyncpa [#allocation9], 0  ;;  %s31_s26 = sshll.u32 %s626_s1, 4  ;;  %s32_s26 = int_to_ptr.hbm [resolvable:$true] %s31_s26 }
   0x3   :  { %15 = vsyncpa [#allocation4], 0  ;;  %s551_s27 = smov [#allocation5]   ;;  %s21_s8 = sshll.u32 %s625_s0, 4  ;;  %s22_s8 = int_to_ptr.hbm [resolvable:$true] %s21_s8 }
   0x4   :  { %s33_s28 = sshll.u32 %s551_s27, 4  ;;  %s552_s9 = smov 64   ;;  %s34_s28 = int_to_ptr.vmem [resolvable:$true] %s33_s28 }
   0x5   :  { %s553_s10 = smov 4   ;;  %s554_s11 = smov [#allocation2]  }
   0x6   :  { %39 = dma.hbm_to_vmem [thread:$0]  %s32_s26, 128, %s34_s28, [#allocation6], %s552_s9, %s552_s9, %s553_s10  }
   0x7   :  { %s23_s12 = sshll.u32 %s554_s11, 4  ;;  %s46_s15 = sshll.u32 %s628_s3, 4  ;;  %s24_s12 = int_to_ptr.vmem [resolvable:$true] %s23_s12  ;;  %s47_s15 = int_to_ptr.hbm [resolvable:$true] %s46_s15 }
   0x8   :  { %26 = dma.hbm_to_vmem [thread:$0]  %s22_s8, 128, %s24_s12, [#allocation3]  }
   0x9   :  { %s61_s17 = sshll.u32 %s630_s5, 4  ;;  %s555_s18 = smov [#allocation7]   ;;  %s62_s17 = int_to_ptr.hbm [resolvable:$true] %s61_s17 }
   0xa   :  { %s48_s19 = sshll.u32 %s555_s18, 4  ;;  %s556_s0 = smov [#allocation8]   ;;  %s49_s19 = int_to_ptr.vmem [resolvable:$true] %s48_s19 }
   0xb   :  { %54 = dma.hbm_to_vmem [thread:$0]  %s47_s15, 1024, %s49_s19, [#allocation6], %s552_s9, %s552_s9, %s553_s10  }
   0xc   :  { %s63_s20 = sshll.u32 %s556_s0, 4  ;;  %s64_s20 = int_to_ptr.vmem [resolvable:$true] %s63_s20 }
   0xd   :  { %69 = dma.hbm_to_vmem [thread:$0]  %s62_s17, 1024, %s64_s20, [#allocation9], %s552_s9, %s552_s9, %s553_s10  }
   0xe   :  { %543 = dma.done.wait [#allocation3], 128  }
   0xf   :  { %544 = vsyncadd [#allocation3], 4294967168 }
  0x10   :  { %545 = dma.done.wait [#allocation6], 1152  }
  0x11   :  { %546 = vsyncadd [#allocation6], 4294966144 }
  0x12   :  { %547 = dma.done.wait [#allocation9], 1024  }
  0x13   :  { %548 = vsyncadd [#allocation9], 4294966272  ;;  %v392_v0 = vld [vmem:[#allocation5] sm:$0xff]  ;;  %v89_v1 = vld [vmem:[#allocation2] sm:$0xff]  ;;  %vm103_vm0 = vcmask 130048   ;;  %v286_v31 = vlaneseq  ;;  %s311_s26 = sshll.u32 %s632_s7, 4  ;;  %s312_s26 = int_to_ptr.hbm [resolvable:$true] %s311_s26 }
  0x14   :  { %v400_v2 = vld [vmem:[#allocation7 + $0x38] sm:$0xff]  ;;  %v90_v3 = vpack.c.bf16 %v89_v1, %v89_v1  ;;  %114 = vmatpush.bf16.msra.mxu0 %v392_v0  ;;  %v399_v4 = vld [vmem:[#allocation7 + $0x30] sm:$0xff]  ;;  %v398_v5 = vld [vmem:[#allocation7 + $0x28] sm:$0xff] }
  0x15   :  { %190 = vmatpush.bf16.msra.mxu1 %v400_v2  ;;  %v397_v6 = vld [vmem:[#allocation7 + $0x20] sm:$0xff]  ;;  %v396_v7 = vld [vmem:[#allocation7 + $0x18] sm:$0xff]  ;;  %v395_v8 = vld [vmem:[#allocation7 + $0x10] sm:$0xff]  ;;  %v287_v32 = vand.u32 127, %v286_v31 }
  0x16   :  { %v394_v9 = vld [vmem:[#allocation7 + $0x8] sm:$0xff]  ;;  %v393_v10 = vld [vmem:[#allocation7] sm:$0xff]  ;;  %v408_v11 = vld [vmem:[#allocation8 + $0x38] sm:$0xff] }
  0x17   :  { %327 = vmatmul.msk.bf16.vlgmr.msra.gmra.mxu0 %vm103_vm0, %v90_v3  ;;  %273 = vmatpush.bf16.msra.mxu2 %v408_v11  ;;  %v407_v12 = vld [vmem:[#allocation8 + $0x30] sm:$0xff]  ;;  %v406_v13 = vld [vmem:[#allocation8 + $0x28] sm:$0xff]  ;;  %v405_v14 = vld [vmem:[#allocation8 + $0x20] sm:$0xff]  ;;  %vm288_vm1 = vcmp.lt.s32.totalorder %v287_v32, 8 }
  0x18   :  { %v404_v15 = vld [vmem:[#allocation8 + $0x18] sm:$0xff]  ;;  %v403_v16 = vld [vmem:[#allocation8 + $0x10] sm:$0xff]  ;;  %v402_v23 = vld [vmem:[#allocation8 + $0x8] sm:$0xff] }
  0x19   :  { %191 = vmatpush.bf16.msra.mxu1 %v399_v4  ;;  %v416_v17 = vld [vmem:[%s627_s2] ss:$0 sm:$0xff]  ;;  %v401_v24 = vld [vmem:[#allocation8] sm:$0xff] }
  0x1a   :  { %v417_v25 = vld [vmem:[%s629_s4] ss:$0 sm:$0xff]  ;;  %s557_s4 = smov [#allocation10]  }
  0x1b   :  { %274 = vmatpush.bf16.msra.mxu2 %v407_v12  ;;  %v418_v33 = vld [vmem:[%s631_s6] ss:$0 sm:$0xff]  ;;  %s309_s6 = sshll.u32 %s557_s4, 4  ;;  %s310_s6 = int_to_ptr.vmem [resolvable:$true] %s309_s6 }
  0x1d   :  { %192 = vmatpush.bf16.msra.mxu1 %v398_v5 }
  0x1f   :  { %275 = vmatpush.bf16.msra.mxu2 %v406_v13 }
  0x21   :  { %193 = vmatpush.bf16.msra.mxu1 %v397_v6 }
  0x23   :  { %276 = vmatpush.bf16.msra.mxu2 %v405_v14 }
  0x25   :  { %194 = vmatpush.bf16.msra.mxu1 %v396_v7 }
  0x27   :  { %277 = vmatpush.bf16.msra.mxu2 %v404_v15 }
  0x29   :  { %195 = vmatpush.bf16.msra.mxu1 %v395_v8 }
  0x2b   :  { %278 = vmatpush.bf16.msra.mxu2 %v403_v16 }
  0x2d   :  { %196 = vmatpush.bf16.msra.mxu1 %v394_v9 }
  0x2f   :  { %279 = vmatpush.bf16.msra.mxu2 %v402_v23 }
  0x31   :  { %197 = vmatpush.bf16.msra.mxu1 %v393_v10 }
  0x33   :  { %280 = vmatpush.bf16.msra.mxu2 %v401_v24 }
  0x94   :  { %v116_v18 = vpop.f32.mrf.mxu0 }
  0x95   :  { %v117_v19 = vadd.f32 %v416_v17, %v116_v18 }
  0x97   :  { %v120_v20 = vmax.f32 %v117_v19, 0.0 }
  0x99   :  { %v121_v21 = vpack.c.bf16 %v120_v20, %v120_v20 }
  0x9b   :  { %198 = vmatmul.bf16.vlgmr.msra.gmra.mxu1 %v121_v21 }
  0x9c   :  { %v118_v22 = vpop.f32.mrf.mxu0 }
 0x118   :  { %v199_v26 = vpop.f32.mrf.mxu1 }
 0x119   :  { %v200_v27 = vadd.f32 %v417_v25, %v199_v26 }
 0x11b   :  { %v203_v28 = vmax.f32 %v200_v27, 0.0 }
 0x11d   :  { %v204_v29 = vpack.c.bf16 %v203_v28, %v203_v28 }
 0x11f   :  { %281 = vmatmul.bf16.vlgmr.msra.gmra.mxu2 %v204_v29 }
 0x120   :  { %v201_v30 = vpop.f32.mrf.mxu1 }
 0x1a2   :  { %v282_v34 = vpop.f32.mrf.mxu2 }
 0x1a3   :  { %v283_v35 = vadd.f32 %v418_v33, %v282_v34 }
 0x1a5   :  { %v289_v36 = vsel %vm288_vm1, %v283_v35, -1e+30 }
 0x1a6   :  { %290 = vmax.xlane.f32.xlu0 %v289_v36 }
 0x1aa   :  { %v284_v37 = vpop.f32.mrf.mxu2 }
 0x219   :  { %v291_v38 = vpop.xlane.xlu0 %290 }
 0x21a   :  { %v292_v39 = vsub.f32 %v289_v36, %v291_v38 }
 0x21c   :  { %v293_v40 = vmul.f32 1.442695, %v292_v39 }
 0x21e   :  { %419 = vpow2.f32 %v293_v40 }
 0x224   :  { %v420_v41 = vpop.eup %419 }
 0x225   :  { %v295_v42 = vsel %vm288_vm1, %v420_v41, 0.0 }
 0x226   :  { %296 = vadd.xlane.f32.xlu0 %v295_v42 }
 0x299   :  { %v297_v43 = vpop.xlane.xlu0 %296 }
 0x29a   :  { %421 = vlog2.f32 %v297_v43 }
 0x2a0   :  { %v422_v44 = vpop.eup %421 }
 0x2a1   :  { %v299_v45 = vmul.f32 0.6931472, %v422_v44 }
 0x2a3   :  { %v300_v46 = vsub.f32 %v292_v39, %v299_v45 }
 0x2a5   :  { %v301_v47 = vsel %vm288_vm1, %v300_v46, 0.0 }
 0x2a6   :  { %v302_v48 = vpack.c.bf16 %v301_v47, %v301_v47 }
 0x2a8   :  { %303 = vst [vmem:[#allocation10] sm:$0xf] %v302_v48 }
 0x2a9   :  { %314 = dma.vmem_to_hbm [thread:$0]  %s310_s6, 64, %s312_s26, [#allocation4]  }
 0x2aa   :  { %549 = dma.done.wait [#allocation4], 64  }
 0x2ab   :  { %550 = vsyncadd [#allocation4], 4294967232 }
 0x2ac   :  { %319 = vsyncpa [#allocation3], 1 }
 0x2ad   :  { %320 = vsyncpa [#allocation6], 1 }
 0x2ae   :  { %321 = vsyncpa [#allocation9], 1 }
 0x2af   :  { %322 = vsyncpa [#allocation4], 1 }

</bundles_post_ra>
